<compile_context>
chip_gen: v7x
topology: tpu7x:2x2x1
jax: 0.10.0
libtpu: 0.0.40
codegen_flags: <defaults>
</compile_context>

<pallas_src>
import functools

import jax
import jax.numpy as jnp
from jax.experimental import pallas as pl
from jax.experimental.pallas import tpu as pltpu

OUT_CHANNELS = 15
KERNEL_SIZE = 3
BN_EPS = 1e-5
LANE = 128


def _cnn_stocks_kernel(w_ref, b_ref, fw_ref, fb_ref, x_ref, o_ref):
    """Fused forward pass on one batch tile (batch on the lane axis).

    w_ref:  (C*K,) SMEM  folded conv weights  w'[c,k] = conv_w[c,k] * bn_scale[c]
    b_ref:  (C,)   SMEM  folded conv bias     b'[c]   = conv_b[c]*scale[c] + shift[c]
    fw_ref: (C,)   SMEM  linear weights
    fb_ref: (1,)   SMEM  linear bias
    x_ref:  (W, TB) VMEM input tile, batch on lanes
    o_ref:  (1, TB) VMEM lane-dense output tile
    """
    W, TB = x_ref.shape
    K = KERNEL_SIZE
    C = OUT_CHANNELS
    L = W - K + 1                                    # num_scores

    x = x_ref[...]                                   # (W, TB)
    x_taps = [x[k:k + L, :] for k in range(K)]       # K shifted (L, TB) slices

    # Running fc accumulator, seeded with the linear bias.
    acc = jnp.full((1, TB), fb_ref[0], dtype=jnp.float32)

    # Per-channel: 3-tap conv on (L, TB) -> max over L (XLU sublane reduce)
    # -> bias + ReLU on the reduced (1, TB) row (monotone ops commute with max)
    # -> fc accumulate.  Intermediates are only ever (L, TB).
    for c in range(C):
        y = x_taps[0] * w_ref[c * K]
        for k in range(1, K):
            y = y + x_taps[k] * w_ref[c * K + k]     # (L, TB)
        m = jnp.max(y, axis=0, keepdims=True)        # (1, TB)
        m = jnp.maximum(m + b_ref[c], jnp.float32(0.0))
        acc = acc + fw_ref[c] * m

    o_ref[...] = acc                                 # (1, TB), lane-dense store


def cnn_stocks_forward(x, params, *, batch_tile=1024):
    """x: (B, W) float32 -> (B,) float32 (eval-mode forward)."""
    x = x.astype(jnp.float32)
    B, W = x.shape
    C, _, K = params["conv_w"].shape
    assert W >= K

    # Fold BN running stats into the conv parameters (eval-mode affine).
    scale = params["gamma"] / jnp.sqrt(params["running_var"] + BN_EPS)
    shift = params["beta"] - params["running_mean"] * scale
    w_fold = (params["conv_w"][:, 0, :] * scale[:, None]).reshape(C * K)
    b_fold = params["conv_b"] * scale + shift
    fw = params["fc_w"].reshape(C).astype(jnp.float32)
    fb = params["fc_b"].reshape(1).astype(jnp.float32)
    w_fold = w_fold.astype(jnp.float32)
    b_fold = b_fold.astype(jnp.float32)

    # Pad batch to a multiple of the lane width and pick the batch tile.
    b_lane = ((B + LANE - 1) // LANE) * LANE
    tb = batch_tile if b_lane >= batch_tile else b_lane      # multiple of 128
    b_pad = ((b_lane + tb - 1) // tb) * tb
    n_tiles = b_pad // tb

    # Batch on lanes: (W, B_pad), zero-padded columns for the fake rows.
    x_t = jnp.zeros((W, b_pad), jnp.float32).at[:, :B].set(x.T)

    smem_spec = pl.BlockSpec(memory_space=pltpu.MemorySpace.SMEM)
    out = pl.pallas_call(
        _cnn_stocks_kernel,
        grid=(n_tiles,),
        in_specs=[smem_spec, smem_spec, smem_spec, smem_spec,
                  pl.BlockSpec((W, tb), lambda i: (0, i))],
        out_specs=pl.BlockSpec((1, tb), lambda i: (0, i)),
        out_shape=jax.ShapeDtypeStruct((1, b_pad), jnp.float32),
        compiler_params=pltpu.CompilerParams(
            dimension_semantics=("parallel",)),
    )(w_fold, b_fold, fw, fb, x_t)
    return out[0, :B]                                         # final .squeeze()


def cnn_stocks_reference(x, params):
    """Plain-JAX reference (eval-mode), independent formulation."""
    x = x.astype(jnp.float32)
    B, W = x.shape
    C, _, K = params["conv_w"].shape
    L = W - K + 1
    patches = jnp.stack([x[:, k:k + L] for k in range(K)], axis=-1)   # (B, L, K)
    conv = jnp.einsum("blk,ck->bcl", patches, params["conv_w"][:, 0, :])
    conv = conv + params["conv_b"][None, :, None]                     # (B, C, L)
    bn = ((conv - params["running_mean"][None, :, None])
          / jnp.sqrt(params["running_var"][None, :, None] + BN_EPS)
          * params["gamma"][None, :, None]
          + params["beta"][None, :, None])
    r = jnp.maximum(bn, 0.0)
    pooled = jnp.max(r, axis=2)                                       # (B, C)
    out = pooled @ params["fc_w"].T + params["fc_b"]                  # (B, 1)
    return out[:, 0]


def init_params(key, window_length):
    assert window_length >= KERNEL_SIZE
    C, K = OUT_CHANNELS, KERNEL_SIZE
    k_conv_w, k_conv_b, k_fc_w, k_fc_b = jax.random.split(key, 4)
    return {
        "conv_w": 0.1 * jax.random.normal(k_conv_w, (C, 1, K), jnp.float32),
        "conv_b": 0.1 * jax.random.normal(k_conv_b, (C,), jnp.float32),
        "gamma": 1.0 + 0.1 * jnp.arange(C, dtype=jnp.float32) / C,
        "beta": 0.05 * jnp.ones((C,), jnp.float32),
        "running_mean": 0.01 * jnp.arange(C, dtype=jnp.float32),
        "running_var": jnp.ones((C,), jnp.float32) + 0.1,
        "fc_w": 0.1 * jax.random.normal(k_fc_w, (1, C), jnp.float32),
        "fc_b": 0.1 * jax.random.normal(k_fc_b, (1,), jnp.float32),
    }


if __name__ == "__main__":
    key = jax.random.PRNGKey(0)
    k_params, k_x1, k_x2 = jax.random.split(key, 3)

    # Small case: batch=4, window_length=16 (single 128-wide lane tile).
    B, W = 4, 16
    params = init_params(k_params, W)
    x = jax.random.normal(k_x1, (B, W), jnp.float32)
    out = jax.jit(functools.partial(cnn_stocks_forward, params=params))(x)
    out = jax.block_until_ready(out)
    ref = cnn_stocks_reference(x, params)
    assert out.shape == (B,)
    assert jnp.allclose(out, ref, atol=1e-5, rtol=1e-5), (out, ref)

    # Multi-tile case: exercises the batch grid + padding path (grid of 3 tiles).
    B2 = 300
    x2 = jax.random.normal(k_x2, (B2, W), jnp.float32)
    out2 = jax.jit(functools.partial(cnn_stocks_forward, params=params,
                                     batch_tile=128))(x2)
    out2 = jax.block_until_ready(out2)
    ref2 = cnn_stocks_reference(x2, params)
    assert out2.shape == (B2,)
    assert jnp.allclose(out2, ref2, atol=1e-5, rtol=1e-5)

    print("KERNEL_OK")
</pallas_src>

<mosaic_0001>
module attributes {stable_mosaic.version = 11 : i64} {
  func.func @_cnn_stocks_kernel(%arg0: i32, %arg1: memref<45xf32, #tpu.memory_space<smem>>, %arg2: memref<15xf32, #tpu.memory_space<smem>>, %arg3: memref<15xf32, #tpu.memory_space<smem>>, %arg4: memref<1xf32, #tpu.memory_space<smem>>, %arg5: memref<16x128xf32, #tpu.memory_space<vmem>>, %arg6: memref<1x128xf32, #tpu.memory_space<vmem>>) attributes {dimension_semantics = [#tpu.dimension_semantics<parallel>], iteration_bounds = array<i64: 1>, scalar_prefetch = 0 : i64, scratch_operands = 0 : i64, tpu.core_type = #tpu.core_type<tc>, window_params = [{transform_indices = @transform_0, window_bounds = array<i64: 45>}, {transform_indices = @transform_1, window_bounds = array<i64: 15>}, {transform_indices = @transform_2, window_bounds = array<i64: 15>}, {transform_indices = @transform_3, window_bounds = array<i64: 1>}, {transform_indices = @transform_4, window_bounds = array<i64: 16, 128>}, {transform_indices = @transform_5, window_bounds = array<i64: 1, 128>}]} {
    %c0 = arith.constant 0 : index
    %c0_0 = arith.constant 0 : index
    %0 = vector.load %arg5[%c0, %c0_0] : memref<16x128xf32, #tpu.memory_space<vmem>>, vector<16x128xf32>
    %1 = vector.extract_strided_slice %0 {offsets = [0, 0], sizes = [14, 128], strides = [1, 1]} : vector<16x128xf32> to vector<14x128xf32>
    %2 = vector.extract_strided_slice %0 {offsets = [1, 0], sizes = [14, 128], strides = [1, 1]} : vector<16x128xf32> to vector<14x128xf32>
    %3 = vector.extract_strided_slice %0 {offsets = [2, 0], sizes = [14, 128], strides = [1, 1]} : vector<16x128xf32> to vector<14x128xf32>
    %c0_1 = arith.constant 0 : index
    %4 = memref.load %arg4[%c0_1] : memref<1xf32, #tpu.memory_space<smem>>
    %5 = vector.broadcast %4 : f32 to vector<1x128xf32>
    %c0_2 = arith.constant 0 : index
    %6 = memref.load %arg1[%c0_2] : memref<45xf32, #tpu.memory_space<smem>>
    %7 = vector.broadcast %6 : f32 to vector<14x128xf32>
    %8 = arith.mulf %1, %7 : vector<14x128xf32>
    %c1 = arith.constant 1 : index
    %9 = memref.load %arg1[%c1] : memref<45xf32, #tpu.memory_space<smem>>
    %10 = vector.broadcast %9 : f32 to vector<14x128xf32>
    %11 = arith.mulf %2, %10 : vector<14x128xf32>
    %12 = arith.addf %8, %11 : vector<14x128xf32>
    %c2 = arith.constant 2 : index
    %13 = memref.load %arg1[%c2] : memref<45xf32, #tpu.memory_space<smem>>
    %14 = vector.broadcast %13 : f32 to vector<14x128xf32>
    %15 = arith.mulf %3, %14 : vector<14x128xf32>
    %16 = arith.addf %12, %15 : vector<14x128xf32>
    %cst = arith.constant dense<0xFF800000> : vector<128xf32>
    %17 = vector.multi_reduction <maximumf>, %16, %cst [0] : vector<14x128xf32> to vector<128xf32>
    %18 = vector.shape_cast %17 : vector<128xf32> to vector<1x128xf32>
    %c0_3 = arith.constant 0 : index
    %19 = memref.load %arg2[%c0_3] : memref<15xf32, #tpu.memory_space<smem>>
    %20 = vector.broadcast %19 : f32 to vector<1x128xf32>
    %21 = arith.addf %18, %20 : vector<1x128xf32>
    %cst_4 = arith.constant 0.000000e+00 : f32
    %22 = vector.broadcast %cst_4 : f32 to vector<1x128xf32>
    %23 = arith.maximumf %21, %22 : vector<1x128xf32>
    %c0_5 = arith.constant 0 : index
    %24 = memref.load %arg3[%c0_5] : memref<15xf32, #tpu.memory_space<smem>>
    %25 = vector.broadcast %24 : f32 to vector<1x128xf32>
    %26 = arith.mulf %25, %23 : vector<1x128xf32>
    %27 = arith.addf %5, %26 : vector<1x128xf32>
    %c3 = arith.constant 3 : index
    %28 = memref.load %arg1[%c3] : memref<45xf32, #tpu.memory_space<smem>>
    %29 = vector.broadcast %28 : f32 to vector<14x128xf32>
    %30 = arith.mulf %1, %29 : vector<14x128xf32>
    %c4 = arith.constant 4 : index
    %31 = memref.load %arg1[%c4] : memref<45xf32, #tpu.memory_space<smem>>
    %32 = vector.broadcast %31 : f32 to vector<14x128xf32>
    %33 = arith.mulf %2, %32 : vector<14x128xf32>
    %34 = arith.addf %30, %33 : vector<14x128xf32>
    %c5 = arith.constant 5 : index
    %35 = memref.load %arg1[%c5] : memref<45xf32, #tpu.memory_space<smem>>
    %36 = vector.broadcast %35 : f32 to vector<14x128xf32>
    %37 = arith.mulf %3, %36 : vector<14x128xf32>
    %38 = arith.addf %34, %37 : vector<14x128xf32>
    %cst_6 = arith.constant dense<0xFF800000> : vector<128xf32>
    %39 = vector.multi_reduction <maximumf>, %38, %cst_6 [0] : vector<14x128xf32> to vector<128xf32>
    %40 = vector.shape_cast %39 : vector<128xf32> to vector<1x128xf32>
    %c1_7 = arith.constant 1 : index
    %41 = memref.load %arg2[%c1_7] : memref<15xf32, #tpu.memory_space<smem>>
    %42 = vector.broadcast %41 : f32 to vector<1x128xf32>
    %43 = arith.addf %40, %42 : vector<1x128xf32>
    %cst_8 = arith.constant 0.000000e+00 : f32
    %44 = vector.broadcast %cst_8 : f32 to vector<1x128xf32>
    %45 = arith.maximumf %43, %44 : vector<1x128xf32>
    %c1_9 = arith.constant 1 : index
    %46 = memref.load %arg3[%c1_9] : memref<15xf32, #tpu.memory_space<smem>>
    %47 = vector.broadcast %46 : f32 to vector<1x128xf32>
    %48 = arith.mulf %47, %45 : vector<1x128xf32>
    %49 = arith.addf %27, %48 : vector<1x128xf32>
    %c6 = arith.constant 6 : index
    %50 = memref.load %arg1[%c6] : memref<45xf32, #tpu.memory_space<smem>>
    %51 = vector.broadcast %50 : f32 to vector<14x128xf32>
    %52 = arith.mulf %1, %51 : vector<14x128xf32>
    %c7 = arith.constant 7 : index
    %53 = memref.load %arg1[%c7] : memref<45xf32, #tpu.memory_space<smem>>
    %54 = vector.broadcast %53 : f32 to vector<14x128xf32>
    %55 = arith.mulf %2, %54 : vector<14x128xf32>
    %56 = arith.addf %52, %55 : vector<14x128xf32>
    %c8 = arith.constant 8 : index
    %57 = memref.load %arg1[%c8] : memref<45xf32, #tpu.memory_space<smem>>
    %58 = vector.broadcast %57 : f32 to vector<14x128xf32>
    %59 = arith.mulf %3, %58 : vector<14x128xf32>
    %60 = arith.addf %56, %59 : vector<14x128xf32>
    %cst_10 = arith.constant dense<0xFF800000> : vector<128xf32>
    %61 = vector.multi_reduction <maximumf>, %60, %cst_10 [0] : vector<14x128xf32> to vector<128xf32>
    %62 = vector.shape_cast %61 : vector<128xf32> to vector<1x128xf32>
    %c2_11 = arith.constant 2 : index
    %63 = memref.load %arg2[%c2_11] : memref<15xf32, #tpu.memory_space<smem>>
    %64 = vector.broadcast %63 : f32 to vector<1x128xf32>
    %65 = arith.addf %62, %64 : vector<1x128xf32>
    %cst_12 = arith.constant 0.000000e+00 : f32
    %66 = vector.broadcast %cst_12 : f32 to vector<1x128xf32>
    %67 = arith.maximumf %65, %66 : vector<1x128xf32>
    %c2_13 = arith.constant 2 : index
    %68 = memref.load %arg3[%c2_13] : memref<15xf32, #tpu.memory_space<smem>>
    %69 = vector.broadcast %68 : f32 to vector<1x128xf32>
    %70 = arith.mulf %69, %67 : vector<1x128xf32>
    %71 = arith.addf %49, %70 : vector<1x128xf32>
    %c9 = arith.constant 9 : index
    %72 = memref.load %arg1[%c9] : memref<45xf32, #tpu.memory_space<smem>>
    %73 = vector.broadcast %72 : f32 to vector<14x128xf32>
    %74 = arith.mulf %1, %73 : vector<14x128xf32>
    %c10 = arith.constant 10 : index
    %75 = memref.load %arg1[%c10] : memref<45xf32, #tpu.memory_space<smem>>
    %76 = vector.broadcast %75 : f32 to vector<14x128xf32>
    %77 = arith.mulf %2, %76 : vector<14x128xf32>
    %78 = arith.addf %74, %77 : vector<14x128xf32>
    %c11 = arith.constant 11 : index
    %79 = memref.load %arg1[%c11] : memref<45xf32, #tpu.memory_space<smem>>
    %80 = vector.broadcast %79 : f32 to vector<14x128xf32>
    %81 = arith.mulf %3, %80 : vector<14x128xf32>
    %82 = arith.addf %78, %81 : vector<14x128xf32>
    %cst_14 = arith.constant dense<0xFF800000> : vector<128xf32>
    %83 = vector.multi_reduction <maximumf>, %82, %cst_14 [0] : vector<14x128xf32> to vector<128xf32>
    %84 = vector.shape_cast %83 : vector<128xf32> to vector<1x128xf32>
    %c3_15 = arith.constant 3 : index
    %85 = memref.load %arg2[%c3_15] : memref<15xf32, #tpu.memory_space<smem>>
    %86 = vector.broadcast %85 : f32 to vector<1x128xf32>
    %87 = arith.addf %84, %86 : vector<1x128xf32>
    %cst_16 = arith.constant 0.000000e+00 : f32
    %88 = vector.broadcast %cst_16 : f32 to vector<1x128xf32>
    %89 = arith.maximumf %87, %88 : vector<1x128xf32>
    %c3_17 = arith.constant 3 : index
    %90 = memref.load %arg3[%c3_17] : memref<15xf32, #tpu.memory_space<smem>>
    %91 = vector.broadcast %90 : f32 to vector<1x128xf32>
    %92 = arith.mulf %91, %89 : vector<1x128xf32>
    %93 = arith.addf %71, %92 : vector<1x128xf32>
    %c12 = arith.constant 12 : index
    %94 = memref.load %arg1[%c12] : memref<45xf32, #tpu.memory_space<smem>>
    %95 = vector.broadcast %94 : f32 to vector<14x128xf32>
    %96 = arith.mulf %1, %95 : vector<14x128xf32>
    %c13 = arith.constant 13 : index
    %97 = memref.load %arg1[%c13] : memref<45xf32, #tpu.memory_space<smem>>
    %98 = vector.broadcast %97 : f32 to vector<14x128xf32>
    %99 = arith.mulf %2, %98 : vector<14x128xf32>
    %100 = arith.addf %96, %99 : vector<14x128xf32>
    %c14 = arith.constant 14 : index
    %101 = memref.load %arg1[%c14] : memref<45xf32, #tpu.memory_space<smem>>
    %102 = vector.broadcast %101 : f32 to vector<14x128xf32>
    %103 = arith.mulf %3, %102 : vector<14x128xf32>
    %104 = arith.addf %100, %103 : vector<14x128xf32>
    %cst_18 = arith.constant dense<0xFF800000> : vector<128xf32>
    %105 = vector.multi_reduction <maximumf>, %104, %cst_18 [0] : vector<14x128xf32> to vector<128xf32>
    %106 = vector.shape_cast %105 : vector<128xf32> to vector<1x128xf32>
    %c4_19 = arith.constant 4 : index
    %107 = memref.load %arg2[%c4_19] : memref<15xf32, #tpu.memory_space<smem>>
    %108 = vector.broadcast %107 : f32 to vector<1x128xf32>
    %109 = arith.addf %106, %108 : vector<1x128xf32>
    %cst_20 = arith.constant 0.000000e+00 : f32
    %110 = vector.broadcast %cst_20 : f32 to vector<1x128xf32>
    %111 = arith.maximumf %109, %110 : vector<1x128xf32>
    %c4_21 = arith.constant 4 : index
    %112 = memref.load %arg3[%c4_21] : memref<15xf32, #tpu.memory_space<smem>>
    %113 = vector.broadcast %112 : f32 to vector<1x128xf32>
    %114 = arith.mulf %113, %111 : vector<1x128xf32>
    %115 = arith.addf %93, %114 : vector<1x128xf32>
    %c15 = arith.constant 15 : index
    %116 = memref.load %arg1[%c15] : memref<45xf32, #tpu.memory_space<smem>>
    %117 = vector.broadcast %116 : f32 to vector<14x128xf32>
    %118 = arith.mulf %1, %117 : vector<14x128xf32>
    %c16 = arith.constant 16 : index
    %119 = memref.load %arg1[%c16] : memref<45xf32, #tpu.memory_space<smem>>
    %120 = vector.broadcast %119 : f32 to vector<14x128xf32>
    %121 = arith.mulf %2, %120 : vector<14x128xf32>
    %122 = arith.addf %118, %121 : vector<14x128xf32>
    %c17 = arith.constant 17 : index
    %123 = memref.load %arg1[%c17] : memref<45xf32, #tpu.memory_space<smem>>
    %124 = vector.broadcast %123 : f32 to vector<14x128xf32>
    %125 = arith.mulf %3, %124 : vector<14x128xf32>
    %126 = arith.addf %122, %125 : vector<14x128xf32>
    %cst_22 = arith.constant dense<0xFF800000> : vector<128xf32>
    %127 = vector.multi_reduction <maximumf>, %126, %cst_22 [0] : vector<14x128xf32> to vector<128xf32>
    %128 = vector.shape_cast %127 : vector<128xf32> to vector<1x128xf32>
    %c5_23 = arith.constant 5 : index
    %129 = memref.load %arg2[%c5_23] : memref<15xf32, #tpu.memory_space<smem>>
    %130 = vector.broadcast %129 : f32 to vector<1x128xf32>
    %131 = arith.addf %128, %130 : vector<1x128xf32>
    %cst_24 = arith.constant 0.000000e+00 : f32
    %132 = vector.broadcast %cst_24 : f32 to vector<1x128xf32>
    %133 = arith.maximumf %131, %132 : vector<1x128xf32>
    %c5_25 = arith.constant 5 : index
    %134 = memref.load %arg3[%c5_25] : memref<15xf32, #tpu.memory_space<smem>>
    %135 = vector.broadcast %134 : f32 to vector<1x128xf32>
    %136 = arith.mulf %135, %133 : vector<1x128xf32>
    %137 = arith.addf %115, %136 : vector<1x128xf32>
    %c18 = arith.constant 18 : index
    %138 = memref.load %arg1[%c18] : memref<45xf32, #tpu.memory_space<smem>>
    %139 = vector.broadcast %138 : f32 to vector<14x128xf32>
    %140 = arith.mulf %1, %139 : vector<14x128xf32>
    %c19 = arith.constant 19 : index
    %141 = memref.load %arg1[%c19] : memref<45xf32, #tpu.memory_space<smem>>
    %142 = vector.broadcast %141 : f32 to vector<14x128xf32>
    %143 = arith.mulf %2, %142 : vector<14x128xf32>
    %144 = arith.addf %140, %143 : vector<14x128xf32>
    %c20 = arith.constant 20 : index
    %145 = memref.load %arg1[%c20] : memref<45xf32, #tpu.memory_space<smem>>
    %146 = vector.broadcast %145 : f32 to vector<14x128xf32>
    %147 = arith.mulf %3, %146 : vector<14x128xf32>
    %148 = arith.addf %144, %147 : vector<14x128xf32>
    %cst_26 = arith.constant dense<0xFF800000> : vector<128xf32>
    %149 = vector.multi_reduction <maximumf>, %148, %cst_26 [0] : vector<14x128xf32> to vector<128xf32>
    %150 = vector.shape_cast %149 : vector<128xf32> to vector<1x128xf32>
    %c6_27 = arith.constant 6 : index
    %151 = memref.load %arg2[%c6_27] : memref<15xf32, #tpu.memory_space<smem>>
    %152 = vector.broadcast %151 : f32 to vector<1x128xf32>
    %153 = arith.addf %150, %152 : vector<1x128xf32>
    %cst_28 = arith.constant 0.000000e+00 : f32
    %154 = vector.broadcast %cst_28 : f32 to vector<1x128xf32>
    %155 = arith.maximumf %153, %154 : vector<1x128xf32>
    %c6_29 = arith.constant 6 : index
    %156 = memref.load %arg3[%c6_29] : memref<15xf32, #tpu.memory_space<smem>>
    %157 = vector.broadcast %156 : f32 to vector<1x128xf32>
    %158 = arith.mulf %157, %155 : vector<1x128xf32>
    %159 = arith.addf %137, %158 : vector<1x128xf32>
    %c21 = arith.constant 21 : index
    %160 = memref.load %arg1[%c21] : memref<45xf32, #tpu.memory_space<smem>>
    %161 = vector.broadcast %160 : f32 to vector<14x128xf32>
    %162 = arith.mulf %1, %161 : vector<14x128xf32>
    %c22 = arith.constant 22 : index
    %163 = memref.load %arg1[%c22] : memref<45xf32, #tpu.memory_space<smem>>
    %164 = vector.broadcast %163 : f32 to vector<14x128xf32>
    %165 = arith.mulf %2, %164 : vector<14x128xf32>
    %166 = arith.addf %162, %165 : vector<14x128xf32>
    %c23 = arith.constant 23 : index
    %167 = memref.load %arg1[%c23] : memref<45xf32, #tpu.memory_space<smem>>
    %168 = vector.broadcast %167 : f32 to vector<14x128xf32>
    %169 = arith.mulf %3, %168 : vector<14x128xf32>
    %170 = arith.addf %166, %169 : vector<14x128xf32>
    %cst_30 = arith.constant dense<0xFF800000> : vector<128xf32>
    %171 = vector.multi_reduction <maximumf>, %170, %cst_30 [0] : vector<14x128xf32> to vector<128xf32>
    %172 = vector.shape_cast %171 : vector<128xf32> to vector<1x128xf32>
    %c7_31 = arith.constant 7 : index
    %173 = memref.load %arg2[%c7_31] : memref<15xf32, #tpu.memory_space<smem>>
    %174 = vector.broadcast %173 : f32 to vector<1x128xf32>
    %175 = arith.addf %172, %174 : vector<1x128xf32>
    %cst_32 = arith.constant 0.000000e+00 : f32
    %176 = vector.broadcast %cst_32 : f32 to vector<1x128xf32>
    %177 = arith.maximumf %175, %176 : vector<1x128xf32>
    %c7_33 = arith.constant 7 : index
    %178 = memref.load %arg3[%c7_33] : memref<15xf32, #tpu.memory_space<smem>>
    %179 = vector.broadcast %178 : f32 to vector<1x128xf32>
    %180 = arith.mulf %179, %177 : vector<1x128xf32>
    %181 = arith.addf %159, %180 : vector<1x128xf32>
    %c24 = arith.constant 24 : index
    %182 = memref.load %arg1[%c24] : memref<45xf32, #tpu.memory_space<smem>>
    %183 = vector.broadcast %182 : f32 to vector<14x128xf32>
    %184 = arith.mulf %1, %183 : vector<14x128xf32>
    %c25 = arith.constant 25 : index
    %185 = memref.load %arg1[%c25] : memref<45xf32, #tpu.memory_space<smem>>
    %186 = vector.broadcast %185 : f32 to vector<14x128xf32>
    %187 = arith.mulf %2, %186 : vector<14x128xf32>
    %188 = arith.addf %184, %187 : vector<14x128xf32>
    %c26 = arith.constant 26 : index
    %189 = memref.load %arg1[%c26] : memref<45xf32, #tpu.memory_space<smem>>
    %190 = vector.broadcast %189 : f32 to vector<14x128xf32>
    %191 = arith.mulf %3, %190 : vector<14x128xf32>
    %192 = arith.addf %188, %191 : vector<14x128xf32>
    %cst_34 = arith.constant dense<0xFF800000> : vector<128xf32>
    %193 = vector.multi_reduction <maximumf>, %192, %cst_34 [0] : vector<14x128xf32> to vector<128xf32>
    %194 = vector.shape_cast %193 : vector<128xf32> to vector<1x128xf32>
    %c8_35 = arith.constant 8 : index
    %195 = memref.load %arg2[%c8_35] : memref<15xf32, #tpu.memory_space<smem>>
    %196 = vector.broadcast %195 : f32 to vector<1x128xf32>
    %197 = arith.addf %194, %196 : vector<1x128xf32>
    %cst_36 = arith.constant 0.000000e+00 : f32
    %198 = vector.broadcast %cst_36 : f32 to vector<1x128xf32>
    %199 = arith.maximumf %197, %198 : vector<1x128xf32>
    %c8_37 = arith.constant 8 : index
    %200 = memref.load %arg3[%c8_37] : memref<15xf32, #tpu.memory_space<smem>>
    %201 = vector.broadcast %200 : f32 to vector<1x128xf32>
    %202 = arith.mulf %201, %199 : vector<1x128xf32>
    %203 = arith.addf %181, %202 : vector<1x128xf32>
    %c27 = arith.constant 27 : index
    %204 = memref.load %arg1[%c27] : memref<45xf32, #tpu.memory_space<smem>>
    %205 = vector.broadcast %204 : f32 to vector<14x128xf32>
    %206 = arith.mulf %1, %205 : vector<14x128xf32>
    %c28 = arith.constant 28 : index
    %207 = memref.load %arg1[%c28] : memref<45xf32, #tpu.memory_space<smem>>
    %208 = vector.broadcast %207 : f32 to vector<14x128xf32>
    %209 = arith.mulf %2, %208 : vector<14x128xf32>
    %210 = arith.addf %206, %209 : vector<14x128xf32>
    %c29 = arith.constant 29 : index
    %211 = memref.load %arg1[%c29] : memref<45xf32, #tpu.memory_space<smem>>
    %212 = vector.broadcast %211 : f32 to vector<14x128xf32>
    %213 = arith.mulf %3, %212 : vector<14x128xf32>
    %214 = arith.addf %210, %213 : vector<14x128xf32>
    %cst_38 = arith.constant dense<0xFF800000> : vector<128xf32>
    %215 = vector.multi_reduction <maximumf>, %214, %cst_38 [0] : vector<14x128xf32> to vector<128xf32>
    %216 = vector.shape_cast %215 : vector<128xf32> to vector<1x128xf32>
    %c9_39 = arith.constant 9 : index
    %217 = memref.load %arg2[%c9_39] : memref<15xf32, #tpu.memory_space<smem>>
    %218 = vector.broadcast %217 : f32 to vector<1x128xf32>
    %219 = arith.addf %216, %218 : vector<1x128xf32>
    %cst_40 = arith.constant 0.000000e+00 : f32
    %220 = vector.broadcast %cst_40 : f32 to vector<1x128xf32>
    %221 = arith.maximumf %219, %220 : vector<1x128xf32>
    %c9_41 = arith.constant 9 : index
    %222 = memref.load %arg3[%c9_41] : memref<15xf32, #tpu.memory_space<smem>>
    %223 = vector.broadcast %222 : f32 to vector<1x128xf32>
    %224 = arith.mulf %223, %221 : vector<1x128xf32>
    %225 = arith.addf %203, %224 : vector<1x128xf32>
    %c30 = arith.constant 30 : index
    %226 = memref.load %arg1[%c30] : memref<45xf32, #tpu.memory_space<smem>>
    %227 = vector.broadcast %226 : f32 to vector<14x128xf32>
    %228 = arith.mulf %1, %227 : vector<14x128xf32>
    %c31 = arith.constant 31 : index
    %229 = memref.load %arg1[%c31] : memref<45xf32, #tpu.memory_space<smem>>
    %230 = vector.broadcast %229 : f32 to vector<14x128xf32>
    %231 = arith.mulf %2, %230 : vector<14x128xf32>
    %232 = arith.addf %228, %231 : vector<14x128xf32>
    %c32 = arith.constant 32 : index
    %233 = memref.load %arg1[%c32] : memref<45xf32, #tpu.memory_space<smem>>
    %234 = vector.broadcast %233 : f32 to vector<14x128xf32>
    %235 = arith.mulf %3, %234 : vector<14x128xf32>
    %236 = arith.addf %232, %235 : vector<14x128xf32>
    %cst_42 = arith.constant dense<0xFF800000> : vector<128xf32>
    %237 = vector.multi_reduction <maximumf>, %236, %cst_42 [0] : vector<14x128xf32> to vector<128xf32>
    %238 = vector.shape_cast %237 : vector<128xf32> to vector<1x128xf32>
    %c10_43 = arith.constant 10 : index
    %239 = memref.load %arg2[%c10_43] : memref<15xf32, #tpu.memory_space<smem>>
    %240 = vector.broadcast %239 : f32 to vector<1x128xf32>
    %241 = arith.addf %238, %240 : vector<1x128xf32>
    %cst_44 = arith.constant 0.000000e+00 : f32
    %242 = vector.broadcast %cst_44 : f32 to vector<1x128xf32>
    %243 = arith.maximumf %241, %242 : vector<1x128xf32>
    %c10_45 = arith.constant 10 : index
    %244 = memref.load %arg3[%c10_45] : memref<15xf32, #tpu.memory_space<smem>>
    %245 = vector.broadcast %244 : f32 to vector<1x128xf32>
    %246 = arith.mulf %245, %243 : vector<1x128xf32>
    %247 = arith.addf %225, %246 : vector<1x128xf32>
    %c33 = arith.constant 33 : index
    %248 = memref.load %arg1[%c33] : memref<45xf32, #tpu.memory_space<smem>>
    %249 = vector.broadcast %248 : f32 to vector<14x128xf32>
    %250 = arith.mulf %1, %249 : vector<14x128xf32>
    %c34 = arith.constant 34 : index
    %251 = memref.load %arg1[%c34] : memref<45xf32, #tpu.memory_space<smem>>
    %252 = vector.broadcast %251 : f32 to vector<14x128xf32>
    %253 = arith.mulf %2, %252 : vector<14x128xf32>
    %254 = arith.addf %250, %253 : vector<14x128xf32>
    %c35 = arith.constant 35 : index
    %255 = memref.load %arg1[%c35] : memref<45xf32, #tpu.memory_space<smem>>
    %256 = vector.broadcast %255 : f32 to vector<14x128xf32>
    %257 = arith.mulf %3, %256 : vector<14x128xf32>
    %258 = arith.addf %254, %257 : vector<14x128xf32>
    %cst_46 = arith.constant dense<0xFF800000> : vector<128xf32>
    %259 = vector.multi_reduction <maximumf>, %258, %cst_46 [0] : vector<14x128xf32> to vector<128xf32>
    %260 = vector.shape_cast %259 : vector<128xf32> to vector<1x128xf32>
    %c11_47 = arith.constant 11 : index
    %261 = memref.load %arg2[%c11_47] : memref<15xf32, #tpu.memory_space<smem>>
    %262 = vector.broadcast %261 : f32 to vector<1x128xf32>
    %263 = arith.addf %260, %262 : vector<1x128xf32>
    %cst_48 = arith.constant 0.000000e+00 : f32
    %264 = vector.broadcast %cst_48 : f32 to vector<1x128xf32>
    %265 = arith.maximumf %263, %264 : vector<1x128xf32>
    %c11_49 = arith.constant 11 : index
    %266 = memref.load %arg3[%c11_49] : memref<15xf32, #tpu.memory_space<smem>>
    %267 = vector.broadcast %266 : f32 to vector<1x128xf32>
    %268 = arith.mulf %267, %265 : vector<1x128xf32>
    %269 = arith.addf %247, %268 : vector<1x128xf32>
    %c36 = arith.constant 36 : index
    %270 = memref.load %arg1[%c36] : memref<45xf32, #tpu.memory_space<smem>>
    %271 = vector.broadcast %270 : f32 to vector<14x128xf32>
    %272 = arith.mulf %1, %271 : vector<14x128xf32>
    %c37 = arith.constant 37 : index
    %273 = memref.load %arg1[%c37] : memref<45xf32, #tpu.memory_space<smem>>
    %274 = vector.broadcast %273 : f32 to vector<14x128xf32>
    %275 = arith.mulf %2, %274 : vector<14x128xf32>
    %276 = arith.addf %272, %275 : vector<14x128xf32>
    %c38 = arith.constant 38 : index
    %277 = memref.load %arg1[%c38] : memref<45xf32, #tpu.memory_space<smem>>
    %278 = vector.broadcast %277 : f32 to vector<14x128xf32>
    %279 = arith.mulf %3, %278 : vector<14x128xf32>
    %280 = arith.addf %276, %279 : vector<14x128xf32>
    %cst_50 = arith.constant dense<0xFF800000> : vector<128xf32>
    %281 = vector.multi_reduction <maximumf>, %280, %cst_50 [0] : vector<14x128xf32> to vector<128xf32>
    %282 = vector.shape_cast %281 : vector<128xf32> to vector<1x128xf32>
    %c12_51 = arith.constant 12 : index
    %283 = memref.load %arg2[%c12_51] : memref<15xf32, #tpu.memory_space<smem>>
    %284 = vector.broadcast %283 : f32 to vector<1x128xf32>
    %285 = arith.addf %282, %284 : vector<1x128xf32>
    %cst_52 = arith.constant 0.000000e+00 : f32
    %286 = vector.broadcast %cst_52 : f32 to vector<1x128xf32>
    %287 = arith.maximumf %285, %286 : vector<1x128xf32>
    %c12_53 = arith.constant 12 : index
    %288 = memref.load %arg3[%c12_53] : memref<15xf32, #tpu.memory_space<smem>>
    %289 = vector.broadcast %288 : f32 to vector<1x128xf32>
    %290 = arith.mulf %289, %287 : vector<1x128xf32>
    %291 = arith.addf %269, %290 : vector<1x128xf32>
    %c39 = arith.constant 39 : index
    %292 = memref.load %arg1[%c39] : memref<45xf32, #tpu.memory_space<smem>>
    %293 = vector.broadcast %292 : f32 to vector<14x128xf32>
    %294 = arith.mulf %1, %293 : vector<14x128xf32>
    %c40 = arith.constant 40 : index
    %295 = memref.load %arg1[%c40] : memref<45xf32, #tpu.memory_space<smem>>
    %296 = vector.broadcast %295 : f32 to vector<14x128xf32>
    %297 = arith.mulf %2, %296 : vector<14x128xf32>
    %298 = arith.addf %294, %297 : vector<14x128xf32>
    %c41 = arith.constant 41 : index
    %299 = memref.load %arg1[%c41] : memref<45xf32, #tpu.memory_space<smem>>
    %300 = vector.broadcast %299 : f32 to vector<14x128xf32>
    %301 = arith.mulf %3, %300 : vector<14x128xf32>
    %302 = arith.addf %298, %301 : vector<14x128xf32>
    %cst_54 = arith.constant dense<0xFF800000> : vector<128xf32>
    %303 = vector.multi_reduction <maximumf>, %302, %cst_54 [0] : vector<14x128xf32> to vector<128xf32>
    %304 = vector.shape_cast %303 : vector<128xf32> to vector<1x128xf32>
    %c13_55 = arith.constant 13 : index
    %305 = memref.load %arg2[%c13_55] : memref<15xf32, #tpu.memory_space<smem>>
    %306 = vector.broadcast %305 : f32 to vector<1x128xf32>
    %307 = arith.addf %304, %306 : vector<1x128xf32>
    %cst_56 = arith.constant 0.000000e+00 : f32
    %308 = vector.broadcast %cst_56 : f32 to vector<1x128xf32>
    %309 = arith.maximumf %307, %308 : vector<1x128xf32>
    %c13_57 = arith.constant 13 : index
    %310 = memref.load %arg3[%c13_57] : memref<15xf32, #tpu.memory_space<smem>>
    %311 = vector.broadcast %310 : f32 to vector<1x128xf32>
    %312 = arith.mulf %311, %309 : vector<1x128xf32>
    %313 = arith.addf %291, %312 : vector<1x128xf32>
    %c42 = arith.constant 42 : index
    %314 = memref.load %arg1[%c42] : memref<45xf32, #tpu.memory_space<smem>>
    %315 = vector.broadcast %314 : f32 to vector<14x128xf32>
    %316 = arith.mulf %1, %315 : vector<14x128xf32>
    %c43 = arith.constant 43 : index
    %317 = memref.load %arg1[%c43] : memref<45xf32, #tpu.memory_space<smem>>
    %318 = vector.broadcast %317 : f32 to vector<14x128xf32>
    %319 = arith.mulf %2, %318 : vector<14x128xf32>
    %320 = arith.addf %316, %319 : vector<14x128xf32>
    %c44 = arith.constant 44 : index
    %321 = memref.load %arg1[%c44] : memref<45xf32, #tpu.memory_space<smem>>
    %322 = vector.broadcast %321 : f32 to vector<14x128xf32>
    %323 = arith.mulf %3, %322 : vector<14x128xf32>
    %324 = arith.addf %320, %323 : vector<14x128xf32>
    %cst_58 = arith.constant dense<0xFF800000> : vector<128xf32>
    %325 = vector.multi_reduction <maximumf>, %324, %cst_58 [0] : vector<14x128xf32> to vector<128xf32>
    %326 = vector.shape_cast %325 : vector<128xf32> to vector<1x128xf32>
    %c14_59 = arith.constant 14 : index
    %327 = memref.load %arg2[%c14_59] : memref<15xf32, #tpu.memory_space<smem>>
    %328 = vector.broadcast %327 : f32 to vector<1x128xf32>
    %329 = arith.addf %326, %328 : vector<1x128xf32>
    %cst_60 = arith.constant 0.000000e+00 : f32
    %330 = vector.broadcast %cst_60 : f32 to vector<1x128xf32>
    %331 = arith.maximumf %329, %330 : vector<1x128xf32>
    %c14_61 = arith.constant 14 : index
    %332 = memref.load %arg3[%c14_61] : memref<15xf32, #tpu.memory_space<smem>>
    %333 = vector.broadcast %332 : f32 to vector<1x128xf32>
    %334 = arith.mulf %333, %331 : vector<1x128xf32>
    %335 = arith.addf %313, %334 : vector<1x128xf32>
    %c0_62 = arith.constant 0 : index
    %c0_63 = arith.constant 0 : index
    %336 = vector.load %arg6[%c0_62, %c0_63] : memref<1x128xf32, #tpu.memory_space<vmem>>, vector<1x128xf32>
    tpu.vector_store %arg6[%c0_62, %c0_63], %335 {strides = array<i32>} : memref<1x128xf32, #tpu.memory_space<vmem>>, vector<1x128xf32>,
    return
  }
  func.func @transform_0(%arg0: i32) -> i32 {
    %c0_i32 = arith.constant 0 : i32
    %c0_i32_0 = arith.constant 0 : i32
    return %c0_i32 : i32
  }
  func.func @transform_1(%arg0: i32) -> i32 {
    %c0_i32 = arith.constant 0 : i32
    %c0_i32_0 = arith.constant 0 : i32
    return %c0_i32 : i32
  }
  func.func @transform_2(%arg0: i32) -> i32 {
    %c0_i32 = arith.constant 0 : i32
    %c0_i32_0 = arith.constant 0 : i32
    return %c0_i32 : i32
  }
  func.func @transform_3(%arg0: i32) -> i32 {
    %c0_i32 = arith.constant 0 : i32
    %c0_i32_0 = arith.constant 0 : i32
    return %c0_i32 : i32
  }
  func.func @transform_4(%arg0: i32) -> (i32, i32) {
    %c0_i32 = arith.constant 0 : i32
    %c0_i32_0 = arith.constant 0 : i32
    return %c0_i32, %arg0 : i32, i32
  }
  func.func @transform_5(%arg0: i32) -> (i32, i32) {
    %c0_i32 = arith.constant 0 : i32
    %c0_i32_0 = arith.constant 0 : i32
    return %c0_i32, %arg0 : i32, i32
  }
}

</mosaic_0001>

<bundles_post_ra>
// kernel: cnn_stocks_forward.1
= control target key start
LH: loop header
LB: loop body
LE: loop exit
PB: predicated region body
PF: predicated region fallthrough
CT: control target
= control target key end

     0   :  { %11 = vsyncpa [#allocation4], 0  ;;  %s1304_s0 = inlined_call_operand.vmem [shape: f32[45], index: 0, kind: input, shape index: {}]   ;;  %s1305_s1 = inlined_call_operand.vmem [shape: f32[15], index: 1, kind: input, shape index: {}]   ;;  %s1306_s2 = inlined_call_operand.vmem [shape: f32[15], index: 2, kind: input, shape index: {}]   ;;  %s1307_s3 = inlined_call_operand.<no memory space> [shape: f32[1], index: 3, kind: input, shape index: {}]   ;;  %s1308_s4 = inlined_call_operand.vmem [shape: f32[16,128], index: 4, kind: input, shape index: {}]   ;;  %s1309_s5 = inlined_call_operand.vmem [shape: f32[1,128], index: 5, kind: output, shape index: {}]  }
   0x1   :  { %12 = vsyncpa [#allocation6], 0  ;;  %s29_s20 = sshll.u32 %s1305_s1, 4  ;;  %s19_s23 = sshll.u32 %s1304_s0, 4  ;;  %s30_s20 = int_to_ptr.vmem [resolvable:$true] %s29_s20  ;;  %s20_s23 = int_to_ptr.vmem [resolvable:$true] %s19_s23 }
   0x2   :  { %s835_s24 = scalar_lea.vmem %s30_s20, 16  ;;  %p840_p1 = scmp.lt.s32.totalorder %s30_s20, %s30_s20 }
   0x3   :  { %p836_p0 = scmp.ne.s32.totalorder %s30_s20, %s835_s24  ;;  %p841_p2 = scmp.lt.s32.totalorder %s835_s24, %s835_s24 }
   0x5   :  { %p842_p3 = por %p841_p2, %p840_p1 }
   0x7   :  { %p843_p4 = pnand %p842_p3, %p836_p0 }
   0x9   :  { %846 = shalt.err (!%p843_p4)
}
   0xa   :  { %s875_s25 = smov [#allocation5]   ;;  %s847_s26 = scalar_lea.vmem %s20_s23, 16 }
   0xb   :  { %32 = dma.vmem_to_smem %s30_s20, 16, %s875_s25, [#allocation6]  }
   0xc   :  { %p848_p5 = scmp.ne.s32.totalorder %s20_s23, %s847_s26  ;;  %p852_p6 = scmp.lt.s32.totalorder %s20_s23, %s20_s23 }
   0xd   :  { %p853_p7 = scmp.lt.s32.totalorder %s847_s26, %s847_s26 }
   0xf   :  { %p854_p8 = por %p853_p7, %p852_p6 }
  0x11   :  { %p855_p9 = pnand %p854_p8, %p848_p5 }
  0x13   :  { %858 = shalt.err (!%p855_p9)
}
  0x14   :  { %s876_s1 = smov [#allocation3]   ;;  %s39_s28 = sshll.u32 %s1306_s2, 4  ;;  %s40_s28 = int_to_ptr.vmem [resolvable:$true] %s39_s28 }
  0x15   :  { %22 = dma.vmem_to_smem %s20_s23, 16, %s876_s1, [#allocation4]  }
  0x16   :  { %s859_s29 = scalar_lea.vmem %s40_s28, 16  ;;  %p864_p11 = scmp.lt.s32.totalorder %s40_s28, %s40_s28 }
  0x17   :  { %p860_p10 = scmp.ne.s32.totalorder %s40_s28, %s859_s29  ;;  %p865_p12 = scmp.lt.s32.totalorder %s859_s29, %s859_s29 }
  0x19   :  { %p866_p13 = por %p865_p12, %p864_p11 }
  0x1b   :  { %p867_p0 = pnand %p866_p13, %p860_p10 }
  0x1d   :  { %870 = shalt.err (!%p867_p0)
}
  0x1e   :  { %s877_s30 = smov [#allocation7]  }
  0x1f   :  { %42 = dma.vmem_to_smem %s40_s28, 16, %s877_s30, [#allocation6]  }
  0x20   :  { %871 = dma.done.wait [#allocation4], 16  }
  0x21   :  { %872 = vsyncadd [#allocation4], 4294967280 }
  0x22   :  { %873 = dma.done.wait [#allocation6], 32  }
  0x23   :  { %874 = vsyncadd [#allocation6], 4294967264 }
  0x24   :  { %56 = sfence }
  0x25   :  { %s61_s6 = sld [smem:[#allocation3]]  ;;  %s760_s7 = sld [smem:[#allocation3 + $0x1]]  ;;  %v924_v0 = vld [vmem:[%s1308_s4] sm:$0xff]  ;;  %v929_v1 = vld [vmem:[%s1308_s4 + $0x8] sm:$0xff]  ;;  %vm71_vm0 = vcmask 1046528   ;;  %vm85_vm1 = vcmask 1045504  }
  0x26   :  { %s761_s8 = sld [smem:[#allocation3 + $0x2]]  ;;  %s917_s9 = sld [smem:[#allocation3 + $0x3]] }
  0x27   :  { %s763_s2 = sld [smem:[#allocation3 + $0x4]]  ;;  %s919_s10 = sld [smem:[#allocation3 + $0x5]] }
  0x28   :  { %s934_s15 = sld [smem:[#allocation3 + $0x6]]  ;;  %s940_s4 = sld [smem:[#allocation3 + $0x7]] }
  0x29   :  { %s945_s16 = sld [smem:[#allocation3 + $0x8]]  ;;  %s953_s17 = sld [smem:[#allocation3 + $0x9]] }
  0x2a   :  { %s958_s18 = sld [smem:[#allocation3 + $0xa]]  ;;  %s960_s19 = sld [smem:[#allocation3 + $0xb]] }
  0x2b   :  { %v62_v2 = vstv %s61_s6  ;;  %v66_v3 = vstv %s760_s7  ;;  %s975_s20 = sld [smem:[#allocation5]]  ;;  %s980_s21 = sld [smem:[#allocation3 + $0xc]] }
  0x2c   :  { %v64_v4 = vmul.f32 %v62_v2, %v929_v1  ;;  %v67_v5 = vmul.f32 %v66_v3, %v924_v0  ;;  %v68_v6 = vmul.f32 %v66_v3, %v929_v1  ;;  %v63_v7 = vmul.f32 %v62_v2, %v924_v0  ;;  %s984_s22 = sld [smem:[#allocation3 + $0xd]]  ;;  %s990_s23 = sld [smem:[#allocation3 + $0xe]] }
  0x2d   :  { %v80_v8 = vstv %s761_s8  ;;  %v110_v9 = vstv %s917_s9  ;;  %v114_v15 = vstv %s763_s2  ;;  %v127_v16 = vstv %s919_s10  ;;  %s992_s24 = sld [smem:[#allocation7]]  ;;  %s994_s25 = sld [smem:[#allocation5 + $0x1]] }
  0x2e   :  { %v72_v10 = vrot.slane %v67_v5, 1  ;;  %v73_v11 = vrot.slane %v68_v6, 1  ;;  %v81_v12 = vmul.f32 %v80_v8, %v924_v0  ;;  %v82_v13 = vmul.f32 %v80_v8, %v929_v1  ;;  %s998_s26 = sld [smem:[#allocation7 + $0x1]]  ;;  %s1001_s1 = sld [smem:[#allocation5 + $0x2]] }
  0x2f   :  { %v112_v14 = vmul.f32 %v110_v9, %v929_v1  ;;  %v115_v22 = vmul.f32 %v114_v15, %v924_v0  ;;  %v116_v23 = vmul.f32 %v114_v15, %v929_v1  ;;  %v128_v24 = vmul.f32 %v127_v16, %v924_v0  ;;  %s1004_s0 = sld [smem:[#allocation3 + $0xf]]  ;;  %s1006_s27 = sld [smem:[#allocation7 + $0x2]] }
  0x30   :  { %v74_v17 = vsel %vm71_vm0, %v72_v10, %v73_v11  ;;  %v78_v18 = vadd.f32 %v73_v11, %v64_v4  ;;  %v86_v19 = vrot.slane %v81_v12, 2  ;;  %v87_v20 = vrot.slane %v82_v13, 2  ;;  %s1011_s28 = sld [smem:[#allocation3 + $0x10]]  ;;  %s1016_s29 = sld [smem:[#allocation5 + $0x3]] }
  0x31   :  { %v77_v21 = vadd.f32 %v74_v17, %v63_v7  ;;  %v111_v27 = vmul.f32 %v110_v9, %v924_v0  ;;  %v129_v28 = vmul.f32 %v127_v16, %v929_v1  ;;  %v119_v30 = vrot.slane %v115_v22, 1  ;;  %s1020_s30 = sld [smem:[#allocation3 + $0x11]]  ;;  %s1031_s8 = sld [smem:[#allocation7 + $0x3]] }
  0x32   :  { %v88_v25 = vsel %vm85_vm1, %v86_v19, %v87_v20  ;;  %v92_v26 = vadd.f32 %v87_v20, %v78_v18  ;;  %v120_v31 = vrot.slane %v116_v23, 1  ;;  %v132_v32 = vrot.slane %v128_v24, 2  ;;  %s1037_s9 = sld [smem:[#allocation3 + $0x13]]  ;;  %s1040_s2 = sld [smem:[#allocation5 + $0x4]] }
  0x33   :  { %v91_v29 = vadd.f32 %v88_v25, %v77_v21  ;;  %v133_v34 = vrot.slane %v129_v28, 2  ;;  %v156_v35 = vstv %s934_s15  ;;  %v160_v42 = vstv %s940_s4  ;;  %s1050_s10 = sld [smem:[#allocation3 + $0x14]]  ;;  %s1060_s12 = sld [smem:[#allocation3 + $0x15]] }
  0x34   :  { %v93_v33 = vsel %vm85_vm1, %v92_v26, -inf  ;;  %v121_v37 = vsel %vm71_vm0, %v119_v30, %v120_v31  ;;  %v125_v38 = vadd.f32 %v120_v31, %v112_v14  ;;  %v158_v41 = vmul.f32 %v156_v35, %v929_v1  ;;  %s1054_s11 = sld [smem:[#allocation7 + $0x4]]  ;;  %s1064_s13 = sld [smem:[#allocation3 + $0x16]] }
  0x35   :  { %v94_v36 = vmax.f32 %v91_v29, %v93_v33  ;;  %v124_v39 = vadd.f32 %v121_v37, %v111_v27  ;;  %v134_v40 = vsel %vm85_vm1, %v132_v32, %v133_v34  ;;  %v161_v45 = vmul.f32 %v160_v42, %v924_v0  ;;  %s1071_s14 = sld [smem:[#allocation3 + $0x17]]  ;;  %s1081_s15 = sld [smem:[#allocation5 + $0x5]] }
  0x36   :  { %v138_v44 = vadd.f32 %v133_v34, %v125_v38  ;;  %v162_v46 = vmul.f32 %v160_v42, %v929_v1  ;;  %v157_v48 = vmul.f32 %v156_v35, %v924_v0  ;;  %v173_v49 = vstv %s945_s16  ;;  %s1083_s4 = sld [smem:[#allocation3 + $0x18]]  ;;  %s1086_s16 = sld [smem:[#allocation7 + $0x5]] }
  0x37   :  { %v95_v43 = vrot.slane %v94_v36, 4  ;;  %v137_v47 = vadd.f32 %v134_v40, %v124_v39  ;;  %v165_v52 = vrot.slane %v161_v45, 1  ;;  %v174_v55 = vmul.f32 %v173_v49, %v924_v0  ;;  %s1190_s6 = sld [smem:[#allocation7 + $0x8]]  ;;  %s1192_s7 = sld [smem:[#allocation5 + $0x9]] }
  0x38   :  { %v139_v51 = vsel %vm85_vm1, %v138_v44, -inf  ;;  %v166_v53 = vrot.slane %v162_v46, 1  ;;  %v175_v56 = vmul.f32 %v173_v49, %v929_v1  ;;  %v202_v57 = vstv %s953_s17  ;;  %s1096_s17 = sld [smem:[#allocation3 + $0x19]] }
  0x39   :  { %v96_v50 = vmax.f32 %v94_v36, %v95_v43  ;;  %v140_v54 = vmax.f32 %v137_v47, %v139_v51  ;;  %v203_v61 = vmul.f32 %v202_v57, %v924_v0  ;;  %v178_v2 = vrot.slane %v174_v55, 2 }
  0x3a   :  { %v167_v59 = vsel %vm71_vm0, %v165_v52, %v166_v53  ;;  %v171_v60 = vadd.f32 %v166_v53, %v158_v41  ;;  %v179_v3 = vrot.slane %v175_v56, 2  ;;  %v204_v5 = vmul.f32 %v202_v57, %v929_v1 }
  0x3b   :  { %v97_v58 = vrot.slane %v96_v50, 2  ;;  %v141_v62 = vrot.slane %v140_v54, 4  ;;  %v170_v63 = vadd.f32 %v167_v59, %v157_v48  ;;  %v206_v6 = vstv %s958_s18  ;;  %s1102_s18 = sld [smem:[#allocation3 + $0x1a]] }
  0x3c   :  { %v219_v7 = vstv %s960_s19  ;;  %v180_v9 = vsel %vm85_vm1, %v178_v2, %v179_v3  ;;  %v184_v10 = vadd.f32 %v179_v3, %v171_v60  ;;  %v207_v11 = vmul.f32 %v206_v6, %v924_v0  ;;  %s1111_s19 = sld [smem:[#allocation5 + $0x6]] }
  0x3d   :  { %v98_v4 = vmax.f32 %v96_v50, %v97_v58  ;;  %v142_v8 = vmax.f32 %v140_v54, %v141_v62  ;;  %v183_v13 = vadd.f32 %v180_v9, %v170_v63  ;;  %v208_v14 = vmul.f32 %v206_v6, %v929_v1 }
  0x3e   :  { %v220_v15 = vmul.f32 %v219_v7, %v924_v0  ;;  %v185_v17 = vsel %vm85_vm1, %v184_v10, -inf  ;;  %v211_v18 = vrot.slane %v207_v11, 1  ;;  %v221_v19 = vmul.f32 %v219_v7, %v929_v1 }
  0x3f   :  { %v99_v12 = vrot.slane %v98_v4, 1  ;;  %v143_v16 = vrot.slane %v142_v8, 2  ;;  %v186_v20 = vmax.f32 %v183_v13, %v185_v17  ;;  %v212_v21 = vrot.slane %v208_v14, 1 }
  0x40   :  { %v224_v22 = vrot.slane %v220_v15, 2  ;;  %v225_v24 = vrot.slane %v221_v19, 2  ;;  %v102_v29 = vstv %s975_s20  ;;  %v248_v34 = vstv %s980_s21  ;;  %s1117_s20 = sld [smem:[#allocation3 + $0x1b]]  ;;  %s1119_s21 = sld [smem:[#allocation3 + $0x1c]] }
  0x41   :  { %v144_v23 = vmax.f32 %v142_v8, %v143_v16  ;;  %v100_v25 = vmax.f32 %v98_v4, %v99_v12  ;;  %v187_v26 = vrot.slane %v186_v20, 4  ;;  %v213_v27 = vsel %vm71_vm0, %v211_v18, %v212_v21 }
  0x42   :  { %v217_v28 = vadd.f32 %v212_v21, %v204_v5  ;;  %v216_v30 = vadd.f32 %v213_v27, %v203_v61  ;;  %v226_v31 = vsel %vm85_vm1, %v224_v22, %v225_v24  ;;  %v252_v37 = vstv %s984_s22  ;;  %s1129_s22 = sld [smem:[#allocation3 + $0x1d]] }
  0x43   :  { %v145_v32 = vrot.slane %v144_v23, 1  ;;  %v188_v35 = vmax.f32 %v186_v20, %v187_v26  ;;  %v103_v38 = vadd.f32 %v102_v29, %v100_v25  ;;  %v253_v40 = vmul.f32 %v252_v37, %v924_v0 }
  0x44   :  { %v230_v33 = vadd.f32 %v225_v24, %v217_v28  ;;  %v229_v36 = vadd.f32 %v226_v31, %v216_v30  ;;  %v250_v42 = vmul.f32 %v248_v34, %v929_v1  ;;  %v254_v43 = vmul.f32 %v252_v37, %v929_v1 }
  0x45   :  { %v265_v44 = vstv %s990_s23  ;;  %v146_v45 = vmax.f32 %v144_v23, %v145_v32  ;;  %v249_v46 = vmul.f32 %v248_v34, %v924_v0  ;;  %v257_v47 = vrot.slane %v253_v40, 1  ;;  %s1139_s23 = sld [smem:[#allocation7 + $0x6]] }
  0x46   :  { %v231_v39 = vsel %vm85_vm1, %v230_v33, -inf  ;;  %v266_v48 = vmul.f32 %v265_v44, %v924_v0  ;;  %v189_v49 = vrot.slane %v188_v35, 2  ;;  %v258_v51 = vrot.slane %v254_v43, 1 }
  0x47   :  { %v232_v41 = vmax.f32 %v229_v36, %v231_v39  ;;  %v267_v52 = vmul.f32 %v265_v44, %v929_v1  ;;  %v60_v53 = vstv %s1307_s3  ;;  %v106_v54 = vstv %s992_s24  ;;  %s1035_s3 = sld [smem:[#allocation3 + $0x12]]  ;;  %s1141_s24 = sld [smem:[#allocation5 + $0x7]] }
  0x48   :  { %v148_v55 = vstv %s994_s25  ;;  %v270_v56 = vrot.slane %v266_v48, 2  ;;  %v152_v57 = vstv %s998_s26  ;;  %v259_v59 = vsel %vm71_vm0, %v257_v47, %v258_v51  ;;  %s1146_s25 = sld [smem:[#allocation3 + $0x1e]]  ;;  %s1152_s26 = sld [smem:[#allocation3 + $0x1f]] }
  0x49   :  { %v233_v50 = vrot.slane %v232_v41, 4  ;;  %v263_v60 = vadd.f32 %v258_v51, %v250_v42  ;;  %v194_v61 = vstv %s1001_s1  ;;  %v262_v62 = vadd.f32 %v259_v59, %v249_v46  ;;  %s1154_s1 = sld [smem:[#allocation3 + $0x20]] }
  0x4a   :  { %v271_v63 = vrot.slane %v267_v52, 2  ;;  %v294_v2 = vstv %s1004_s0  ;;  %v104_v3 = vmax.f32 %v103_v38, 0.0  ;;  %v149_v4 = vadd.f32 %v148_v55, %v146_v45  ;;  %s1163_s0 = sld [smem:[#allocation7 + $0x7]] }
  0x4b   :  { %v234_v58 = vmax.f32 %v232_v41, %v233_v50  ;;  %v190_v5 = vmax.f32 %v188_v35, %v189_v49  ;;  %v198_v6 = vstv %s1006_s27  ;;  %v298_v10 = vstv %s1011_s28  ;;  %s1165_s27 = sld [smem:[#allocation5 + $0x8]]  ;;  %s1170_s28 = sld [smem:[#allocation3 + $0x21]] }
  0x4c   :  { %v272_v8 = vsel %vm85_vm1, %v270_v56, %v271_v63  ;;  %v276_v9 = vadd.f32 %v271_v63, %v263_v60  ;;  %v296_v12 = vmul.f32 %v294_v2, %v929_v1  ;;  %v299_v13 = vmul.f32 %v298_v10, %v924_v0 }
  0x4d   :  { %v235_v7 = vrot.slane %v234_v58, 2  ;;  %v275_v11 = vadd.f32 %v272_v8, %v262_v62  ;;  %v300_v14 = vmul.f32 %v298_v10, %v929_v1  ;;  %v240_v15 = vstv %s1016_s29  ;;  %s1176_s29 = sld [smem:[#allocation3 + $0x22]] }
  0x4e   :  { %v277_v16 = vsel %vm85_vm1, %v276_v9, -inf  ;;  %v295_v17 = vmul.f32 %v294_v2, %v924_v0  ;;  %v311_v18 = vstv %s1020_s30  ;;  %v107_v19 = vmul.f32 %v106_v54, %v104_v3  ;;  %s1178_s30 = sld [smem:[#allocation3 + $0x23]] }
  0x4f   :  { %v278_v20 = vmax.f32 %v275_v11, %v277_v16  ;;  %v303_v21 = vrot.slane %v299_v13, 1  ;;  %v304_v22 = vrot.slane %v300_v14, 1  ;;  %v150_v23 = vmax.f32 %v149_v4, 0.0 }
  0x50   :  { %v191_v24 = vrot.slane %v190_v5, 1  ;;  %v312_v25 = vmul.f32 %v311_v18, %v924_v0  ;;  %v313_v26 = vmul.f32 %v311_v18, %v929_v1  ;;  %v236_v27 = vmax.f32 %v234_v58, %v235_v7 }
  0x51   :  { %v279_v28 = vrot.slane %v278_v20, 4  ;;  %v305_v29 = vsel %vm71_vm0, %v303_v21, %v304_v22  ;;  %v309_v30 = vadd.f32 %v304_v22, %v296_v12  ;;  %v244_v31 = vstv %s1031_s8  ;;  %s1197_s8 = sld [smem:[#allocation3 + $0x24]] }
  0x52   :  { %v308_v32 = vadd.f32 %v305_v29, %v295_v17  ;;  %v316_v33 = vrot.slane %v312_v25, 2  ;;  %v317_v34 = vrot.slane %v313_v26, 2  ;;  %v108_v35 = vadd.f32 %v107_v19, %v60_v53 }
  0x53   :  { %v280_v36 = vmax.f32 %v278_v20, %v279_v28  ;;  %v340_v37 = vstv %s1035_s3  ;;  %v344_v38 = vstv %s1037_s9  ;;  %v192_v39 = vmax.f32 %v190_v5, %v191_v24  ;;  %s1201_s3 = sld [smem:[#allocation3 + $0x25]]  ;;  %s1203_s9 = sld [smem:[#allocation3 + $0x26]] }
  0x54   :  { %v286_v40 = vstv %s1040_s2  ;;  %v318_v41 = vsel %vm85_vm1, %v316_v33, %v317_v34  ;;  %v322_v42 = vadd.f32 %v317_v34, %v309_v30  ;;  %v153_v43 = vmul.f32 %v152_v57, %v150_v23  ;;  %s1212_s2 = sld [smem:[#allocation7 + $0x9]] }
  0x55   :  { %v237_v44 = vrot.slane %v236_v27, 1  ;;  %v321_v45 = vadd.f32 %v318_v41, %v308_v32  ;;  %v345_v46 = vmul.f32 %v344_v38, %v924_v0  ;;  %v342_v48 = vmul.f32 %v340_v37, %v929_v1 }
  0x56   :  { %v323_v47 = vsel %vm85_vm1, %v322_v42, -inf  ;;  %v346_v49 = vmul.f32 %v344_v38, %v929_v1  ;;  %v357_v50 = vstv %s1050_s10  ;;  %v281_v51 = vrot.slane %v280_v36, 2  ;;  %s1218_s10 = sld [smem:[#allocation5 + $0xa]] }
  0x57   :  { %v324_v52 = vmax.f32 %v321_v45, %v323_v47  ;;  %v341_v53 = vmul.f32 %v340_v37, %v924_v0  ;;  %v349_v54 = vrot.slane %v345_v46, 1  ;;  %v195_v55 = vadd.f32 %v194_v61, %v192_v39 }
  0x58   :  { %v350_v56 = vrot.slane %v346_v49, 1  ;;  %v358_v57 = vmul.f32 %v357_v50, %v924_v0  ;;  %v359_v58 = vmul.f32 %v357_v50, %v929_v1  ;;  %v1078_v59 = vadd.f32 %v153_v43, %v108_v35 }
  0x59   :  { %v238_v60 = vmax.f32 %v236_v27, %v237_v44  ;;  %v290_v62 = vstv %s1054_s11  ;;  %v325_v63 = vrot.slane %v324_v52, 4  ;;  %v282_v5 = vmax.f32 %v280_v36, %v281_v51  ;;  %s1220_s11 = sld [smem:[#allocation3 + $0x27]] }
  0x5a   :  { %v351_v2 = vsel %vm71_vm0, %v349_v54, %v350_v56  ;;  %v355_v61 = vadd.f32 %v350_v56, %v342_v48  ;;  %v362_v3 = vrot.slane %v358_v57, 2  ;;  %v363_v4 = vrot.slane %v359_v58, 2 }
  0x5b   :  { %v326_v7 = vmax.f32 %v324_v52, %v325_v63  ;;  %v354_v8 = vadd.f32 %v351_v2, %v341_v53  ;;  %v386_v9 = vstv %s1060_s12  ;;  %v196_v10 = vmax.f32 %v195_v55, 0.0  ;;  %s1229_s12 = sld [smem:[#allocation3 + $0x28]] }
  0x5c   :  { %v364_v11 = vsel %vm85_vm1, %v362_v3, %v363_v4  ;;  %v368_v12 = vadd.f32 %v363_v4, %v355_v61  ;;  %v390_v13 = vstv %s1064_s13  ;;  %v1093_v14 = vadd.f32 %v240_v15, %v238_v60  ;;  %s1231_s13 = sld [smem:[#allocation3 + $0x29]] }
  0x5d   :  { %v327_v16 = vrot.slane %v326_v7, 2  ;;  %v367_v17 = vadd.f32 %v364_v11, %v354_v8  ;;  %v391_v18 = vmul.f32 %v390_v13, %v924_v0  ;;  %v388_v20 = vmul.f32 %v386_v9, %v929_v1 }
  0x5e   :  { %v369_v19 = vsel %vm85_vm1, %v368_v12, -inf  ;;  %v392_v21 = vmul.f32 %v390_v13, %v929_v1  ;;  %v403_v22 = vstv %s1071_s14  ;;  %v283_v15 = vrot.slane %v282_v5, 1  ;;  %s1241_s14 = sld [smem:[#allocation7 + $0xa]] }
  0x5f   :  { %v370_v23 = vmax.f32 %v367_v17, %v369_v19  ;;  %v387_v24 = vmul.f32 %v386_v9, %v924_v0  ;;  %v395_v25 = vrot.slane %v391_v18, 1  ;;  %v328_v26 = vmax.f32 %v326_v7, %v327_v16 }
  0x60   :  { %v396_v27 = vrot.slane %v392_v21, 1  ;;  %v404_v28 = vmul.f32 %v403_v22, %v924_v0  ;;  %v405_v29 = vmul.f32 %v403_v22, %v929_v1  ;;  %v199_v30 = vmul.f32 %v198_v6, %v196_v10 }
  0x61   :  { %v332_v32 = vstv %s1081_s15  ;;  %v371_v33 = vrot.slane %v370_v23, 4  ;;  %v432_v34 = vstv %s1083_s4  ;;  %v242_v39 = vmax.f32 %v1093_v14, 0.0  ;;  %s1247_s15 = sld [smem:[#allocation3 + $0x2a]]  ;;  %s1257_s4 = sld [smem:[#allocation3 + $0x2b]] }
  0x62   :  { %v397_v35 = vsel %vm71_vm0, %v395_v25, %v396_v27  ;;  %v401_v36 = vadd.f32 %v396_v27, %v388_v20  ;;  %v408_v37 = vrot.slane %v404_v28, 2  ;;  %v409_v38 = vrot.slane %v405_v29, 2 }
  0x63   :  { %v336_v41 = vstv %s1086_s16  ;;  %v372_v42 = vmax.f32 %v370_v23, %v371_v33  ;;  %v400_v43 = vadd.f32 %v397_v35, %v387_v24  ;;  %v284_v44 = vmax.f32 %v282_v5, %v283_v15  ;;  %s1259_s16 = sld [smem:[#allocation3 + $0x2c]] }
  0x64   :  { %v329_v45 = vrot.slane %v328_v26, 1  ;;  %v410_v6 = vsel %vm85_vm1, %v408_v37, %v409_v38  ;;  %v414_v46 = vadd.f32 %v409_v38, %v401_v36  ;;  %v434_v49 = vmul.f32 %v432_v34, %v929_v1 }
  0x65   :  { %v373_v47 = vrot.slane %v372_v42, 2  ;;  %v413_v48 = vadd.f32 %v410_v6, %v400_v43  ;;  %v436_v50 = vstv %s1096_s17  ;;  %v449_v54 = vstv %s1102_s18  ;;  %s1268_s17 = sld [smem:[#allocation5 + $0xb]]  ;;  %s1277_s18 = sld [smem:[#allocation5 + $0xc]] }
  0x66   :  { %v415_v51 = vsel %vm85_vm1, %v414_v46, -inf  ;;  %v437_v52 = vmul.f32 %v436_v50, %v924_v0  ;;  %v438_v53 = vmul.f32 %v436_v50, %v929_v1  ;;  %v433_v57 = vmul.f32 %v432_v34, %v924_v0 }
  0x67   :  { %v374_v55 = vmax.f32 %v372_v42, %v373_v47  ;;  %v416_v56 = vmax.f32 %v413_v48, %v415_v51  ;;  %v450_v58 = vmul.f32 %v449_v54, %v924_v0  ;;  %v200_v60 = vadd.f32 %v199_v30, %v1078_v59 }
  0x68   :  { %v441_v63 = vrot.slane %v437_v52, 1  ;;  %v442_v2 = vrot.slane %v438_v53, 1  ;;  %v451_v61 = vmul.f32 %v449_v54, %v929_v1  ;;  %v287_v3 = vadd.f32 %v286_v40, %v284_v44 }
  0x69   :  { %v330_v4 = vmax.f32 %v328_v26, %v329_v45  ;;  %v417_v5 = vrot.slane %v416_v56, 4  ;;  %v454_v7 = vrot.slane %v450_v58, 2  ;;  %v378_v8 = vstv %s1111_s19  ;;  %s1289_s19 = sld [smem:[#allocation7 + $0xb]] }
  0x6a   :  { %v443_v9 = vsel %vm71_vm0, %v441_v63, %v442_v2  ;;  %v447_v10 = vadd.f32 %v442_v2, %v434_v49  ;;  %v455_v11 = vrot.slane %v451_v61, 2  ;;  %v245_v12 = vmul.f32 %v244_v31, %v242_v39 }
  0x6b   :  { %v375_v13 = vrot.slane %v374_v55, 1  ;;  %v418_v59 = vmax.f32 %v416_v56, %v417_v5  ;;  %v446_v14 = vadd.f32 %v443_v9, %v433_v57  ;;  %v478_v17 = vstv %s1117_s20  ;;  %s1293_s20 = sld [smem:[#allocation5 + $0xd]] }
  0x6c   :  { %v456_v40 = vsel %vm85_vm1, %v454_v7, %v455_v11  ;;  %v460_v16 = vadd.f32 %v455_v11, %v447_v10  ;;  %v482_v18 = vstv %s1119_s21  ;;  %v288_v19 = vmax.f32 %v287_v3, 0.0  ;;  %s821_s21 = sld [smem:[#allocation7 + $0xc]] }
  0x6d   :  { %v333_v20 = vadd.f32 %v332_v32, %v330_v4  ;;  %v419_v21 = vrot.slane %v418_v59, 2  ;;  %v459_v22 = vadd.f32 %v456_v40, %v446_v14  ;;  %v480_v15 = vmul.f32 %v478_v17, %v929_v1 }
  0x6e   :  { %v461_v31 = vsel %vm85_vm1, %v460_v16, -inf  ;;  %v483_v23 = vmul.f32 %v482_v18, %v924_v0  ;;  %v484_v24 = vmul.f32 %v482_v18, %v929_v1  ;;  %v376_v25 = vmax.f32 %v374_v55, %v375_v13 }
  0x6f   :  { %v462_v26 = vmax.f32 %v459_v22, %v461_v31  ;;  %v479_v27 = vmul.f32 %v478_v17, %v924_v0  ;;  %v495_v28 = vstv %s1129_s22  ;;  %v246_v34 = vadd.f32 %v245_v12, %v200_v60  ;;  %s826_s22 = sld [smem:[#allocation7 + $0xd]] }
  0x70   :  { %v487_v29 = vrot.slane %v483_v23, 1  ;;  %v488_v30 = vrot.slane %v484_v24, 1  ;;  %v496_v32 = vmul.f32 %v495_v28, %v924_v0  ;;  %v497_v33 = vmul.f32 %v495_v28, %v929_v1 }
  0x71   :  { %v291_v35 = vmul.f32 %v290_v62, %v288_v19  ;;  %v420_v36 = vmax.f32 %v418_v59, %v419_v21  ;;  %v463_v37 = vrot.slane %v462_v26, 4  ;;  %v334_v44 = vmax.f32 %v333_v20, 0.0 }
  0x72   :  { %v489_v38 = vsel %vm71_vm0, %v487_v29, %v488_v30  ;;  %v493_v39 = vadd.f32 %v488_v30, %v480_v15  ;;  %v500_v42 = vrot.slane %v496_v32, 2  ;;  %v501_v43 = vrot.slane %v497_v33, 2 }
  0x73   :  { %v379_v45 = vadd.f32 %v378_v8, %v376_v25  ;;  %v464_v6 = vmax.f32 %v462_v26, %v463_v37  ;;  %v492_v46 = vadd.f32 %v489_v38, %v479_v27  ;;  %v382_v62 = vstv %s1139_s23  ;;  %s830_s23 = sld [smem:[#allocation5 + $0xe]] }
  0x74   :  { %v424_v47 = vstv %s1141_s24  ;;  %v502_v48 = vsel %vm85_vm1, %v500_v42, %v501_v43  ;;  %v506_v49 = vadd.f32 %v501_v43, %v493_v39  ;;  %v292_v50 = vadd.f32 %v291_v35, %v246_v34  ;;  %s831_s24 = sld [smem:[#allocation7 + $0xe]] }
  0x75   :  { %v465_v51 = vrot.slane %v464_v6, 2  ;;  %v505_v52 = vadd.f32 %v502_v48, %v492_v46  ;;  %v524_v53 = vstv %s1146_s25  ;;  %v421_v54 = vrot.slane %v420_v36, 1 }
  0x76   :  { %v507_v55 = vsel %vm85_vm1, %v506_v49, -inf  ;;  %v528_v56 = vstv %s1152_s26  ;;  %v541_v57 = vstv %s1154_s1  ;;  %v337_v58 = vmul.f32 %v336_v41, %v334_v44 }
  0x77   :  { %v380_v60 = vmax.f32 %v379_v45, 0.0  ;;  %v508_v63 = vmax.f32 %v505_v52, %v507_v55  ;;  %v529_v2 = vmul.f32 %v528_v56, %v924_v0  ;;  %v526_v61 = vmul.f32 %v524_v53, %v929_v1 }
  0x78   :  { %v530_v3 = vmul.f32 %v528_v56, %v929_v1  ;;  %v542_v4 = vmul.f32 %v541_v57, %v924_v0  ;;  %v543_v5 = vmul.f32 %v541_v57, %v929_v1  ;;  %v466_v7 = vmax.f32 %v464_v6, %v465_v51 }
  0x79   :  { %v509_v8 = vrot.slane %v508_v63, 4  ;;  %v525_v9 = vmul.f32 %v524_v53, %v924_v0  ;;  %v533_v41 = vrot.slane %v529_v2, 1  ;;  %v422_v10 = vmax.f32 %v420_v36, %v421_v54 }
  0x7a   :  { %v534_v11 = vrot.slane %v530_v3, 1  ;;  %v546_v12 = vrot.slane %v542_v4, 2  ;;  %v547_v13 = vrot.slane %v543_v5, 2  ;;  %v338_v59 = vadd.f32 %v337_v58, %v292_v50 }
  0x7b   :  { %v428_v14 = vstv %s1163_s0  ;;  %v470_v40 = vstv %s1165_s27  ;;  %v510_v16 = vmax.f32 %v508_v63, %v509_v8  ;;  %v570_v20 = vstv %s1170_s28 }
  0x7c   :  { %v535_v17 = vsel %vm71_vm0, %v533_v41, %v534_v11  ;;  %v539_v18 = vadd.f32 %v534_v11, %v526_v61  ;;  %v548_v19 = vsel %vm85_vm1, %v546_v12, %v547_v13  ;;  %v383_v21 = vmul.f32 %v382_v62, %v380_v60 }
  0x7d   :  { %v467_v22 = vrot.slane %v466_v7, 1  ;;  %v511_v31 = vrot.slane %v510_v16, 2  ;;  %v538_v15 = vadd.f32 %v535_v17, %v525_v9  ;;  %v425_v23 = vadd.f32 %v424_v47, %v422_v10 }
  0x7e   :  { %v552_v24 = vadd.f32 %v547_v13, %v539_v18  ;;  %v574_v25 = vstv %s1176_s29  ;;  %v587_v26 = vstv %s1178_s30  ;;  %v572_v29 = vmul.f32 %v570_v20, %v929_v1 }
  0x7f   :  { %v512_v27 = vmax.f32 %v510_v16, %v511_v31  ;;  %v551_v28 = vadd.f32 %v548_v19, %v538_v15  ;;  %v575_v30 = vmul.f32 %v574_v25, %v924_v0  ;;  %v576_v33 = vmul.f32 %v574_v25, %v929_v1 }
  0x80   :  { %v553_v32 = vsel %vm85_vm1, %v552_v24, -inf  ;;  %v588_v34 = vmul.f32 %v587_v26, %v924_v0  ;;  %v589_v35 = vmul.f32 %v587_v26, %v929_v1  ;;  %v468_v36 = vmax.f32 %v466_v7, %v467_v22 }
  0x81   :  { %v554_v37 = vmax.f32 %v551_v28, %v553_v32  ;;  %v571_v38 = vmul.f32 %v570_v20, %v924_v0  ;;  %v579_v39 = vrot.slane %v575_v30, 1  ;;  %v513_v42 = vrot.slane %v512_v27, 1 }
  0x82   :  { %v580_v43 = vrot.slane %v576_v33, 1  ;;  %v592_v44 = vrot.slane %v588_v34, 2  ;;  %v593_v45 = vrot.slane %v589_v35, 2  ;;  %v1214_v6 = vadd.f32 %v383_v21, %v338_v59 }
  0x83   :  { %v474_v46 = vstv %s1190_s6  ;;  %v516_v62 = vstv %s1192_s7  ;;  %v555_v47 = vrot.slane %v554_v37, 4  ;;  %v616_v51 = vstv %s1197_s8 }
  0x84   :  { %v581_v48 = vsel %vm71_vm0, %v579_v39, %v580_v43  ;;  %v585_v49 = vadd.f32 %v580_v43, %v572_v29  ;;  %v594_v50 = vsel %vm85_vm1, %v592_v44, %v593_v45  ;;  %v426_v52 = vmax.f32 %v425_v23, 0.0 }
  0x85   :  { %v1225_v53 = vadd.f32 %v470_v40, %v468_v36  ;;  %v556_v54 = vmax.f32 %v554_v37, %v555_v47  ;;  %v584_v55 = vadd.f32 %v581_v48, %v571_v38  ;;  %v514_v56 = vmax.f32 %v512_v27, %v513_v42 }
  0x86   :  { %v598_v57 = vadd.f32 %v593_v45, %v585_v49  ;;  %v620_v58 = vstv %s1201_s3  ;;  %v633_v60 = vstv %s1203_s9  ;;  %v618_v61 = vmul.f32 %v616_v51, %v929_v1 }
  0x87   :  { %v557_v63 = vrot.slane %v556_v54, 2  ;;  %v597_v2 = vadd.f32 %v594_v50, %v584_v55  ;;  %v621_v3 = vmul.f32 %v620_v58, %v924_v0  ;;  %v622_v5 = vmul.f32 %v620_v58, %v929_v1 }
  0x88   :  { %v599_v4 = vsel %vm85_vm1, %v598_v57, -inf  ;;  %v634_v7 = vmul.f32 %v633_v60, %v924_v0  ;;  %v635_v8 = vmul.f32 %v633_v60, %v929_v1  ;;  %v617_v10 = vmul.f32 %v616_v51, %v924_v0 }
  0x89   :  { %v558_v9 = vmax.f32 %v556_v54, %v557_v63  ;;  %v600_v41 = vmax.f32 %v597_v2, %v599_v4  ;;  %v625_v11 = vrot.slane %v621_v3, 1  ;;  %v520_v12 = vstv %s1212_s2 }
  0x8a   :  { %v626_v13 = vrot.slane %v622_v5, 1  ;;  %v638_v59 = vrot.slane %v634_v7, 2  ;;  %v639_v40 = vrot.slane %v635_v8, 2  ;;  %v429_v16 = vmul.f32 %v428_v14, %v426_v52 }
  0x8b   :  { %v562_v17 = vstv %s1218_s10  ;;  %v601_v18 = vrot.slane %v600_v41, 4  ;;  %v662_v19 = vstv %s1220_s11  ;;  %v472_v20 = vmax.f32 %v1225_v53, 0.0 }
  0x8c   :  { %v627_v21 = vsel %vm71_vm0, %v625_v11, %v626_v13  ;;  %v631_v22 = vadd.f32 %v626_v13, %v618_v61  ;;  %v640_v31 = vsel %vm85_vm1, %v638_v59, %v639_v40  ;;  %v1252_v15 = vadd.f32 %v516_v62, %v514_v56 }
  0x8d   :  { %v559_v23 = vrot.slane %v558_v9, 1  ;;  %v602_v24 = vmax.f32 %v600_v41, %v601_v18  ;;  %v630_v25 = vadd.f32 %v627_v21, %v617_v10  ;;  %v663_v14 = vmul.f32 %v662_v19, %v924_v0 }
  0x8e   :  { %v644_v26 = vadd.f32 %v639_v40, %v631_v22  ;;  %v666_v27 = vstv %s1229_s12  ;;  %v679_v28 = vstv %s1231_s13  ;;  %v664_v32 = vmul.f32 %v662_v19, %v929_v1 }
  0x8f   :  { %v603_v29 = vrot.slane %v602_v24, 2  ;;  %v643_v30 = vadd.f32 %v640_v31, %v630_v25  ;;  %v667_v33 = vmul.f32 %v666_v27, %v924_v0  ;;  %v668_v35 = vmul.f32 %v666_v27, %v929_v1 }
  0x90   :  { %v645_v34 = vsel %vm85_vm1, %v644_v26, -inf  ;;  %v680_v36 = vmul.f32 %v679_v28, %v924_v0  ;;  %v681_v37 = vmul.f32 %v679_v28, %v929_v1  ;;  %v560_v38 = vmax.f32 %v558_v9, %v559_v23 }
  0x91   :  { %v604_v39 = vmax.f32 %v602_v24, %v603_v29  ;;  %v646_v42 = vmax.f32 %v643_v30, %v645_v34  ;;  %v671_v43 = vrot.slane %v667_v33, 1  ;;  %v566_v44 = vstv %s1241_s14 }
  0x92   :  { %v672_v45 = vrot.slane %v668_v35, 1  ;;  %v684_v62 = vrot.slane %v680_v36, 2  ;;  %v685_v47 = vrot.slane %v681_v37, 2  ;;  %v430_v48 = vadd.f32 %v429_v16, %v1214_v6 }
  0x93   :  { %v475_v49 = vmul.f32 %v474_v46, %v472_v20  ;;  %v647_v50 = vrot.slane %v646_v42, 4  ;;  %v708_v51 = vstv %s1247_s15  ;;  %v518_v52 = vmax.f32 %v1252_v15, 0.0 }
  0x94   :  { %v673_v53 = vsel %vm71_vm0, %v671_v43, %v672_v45  ;;  %v677_v54 = vadd.f32 %v672_v45, %v664_v32  ;;  %v686_v55 = vsel %vm85_vm1, %v684_v62, %v685_v47  ;;  %v563_v56 = vadd.f32 %v562_v17, %v560_v38 }
  0x95   :  { %v605_v57 = vrot.slane %v604_v39, 1  ;;  %v648_v58 = vmax.f32 %v646_v42, %v647_v50  ;;  %v676_v60 = vadd.f32 %v673_v53, %v663_v14  ;;  %v709_v6 = vmul.f32 %v708_v51, %v924_v0 }
  0x96   :  { %v690_v63 = vadd.f32 %v685_v47, %v677_v54  ;;  %v712_v46 = vstv %s1257_s4  ;;  %v725_v2 = vstv %s1259_s16  ;;  %v710_v4 = vmul.f32 %v708_v51, %v929_v1 }
  0x97   :  { %v649_v61 = vrot.slane %v648_v58, 2  ;;  %v689_v3 = vadd.f32 %v686_v55, %v676_v60  ;;  %v713_v5 = vmul.f32 %v712_v46, %v924_v0  ;;  %v714_v8 = vmul.f32 %v712_v46, %v929_v1 }
  0x98   :  { %v691_v7 = vsel %vm85_vm1, %v690_v63, -inf  ;;  %v726_v9 = vmul.f32 %v725_v2, %v924_v0  ;;  %v727_v41 = vmul.f32 %v725_v2, %v929_v1  ;;  %v606_v10 = vmax.f32 %v604_v39, %v605_v57 }
  0x99   :  { %v650_v11 = vmax.f32 %v648_v58, %v649_v61  ;;  %v692_v13 = vmax.f32 %v689_v3, %v691_v7  ;;  %v717_v59 = vrot.slane %v713_v5, 1  ;;  %v608_v40 = vstv %s1268_s17 }
  0x9a   :  { %v718_v16 = vrot.slane %v714_v8, 1  ;;  %v730_v17 = vrot.slane %v726_v9, 2  ;;  %v731_v18 = vrot.slane %v727_v41, 2  ;;  %v476_v19 = vadd.f32 %v475_v49, %v430_v48 }
  0x9b   :  { %v521_v20 = vmul.f32 %v520_v12, %v518_v52  ;;  %v651_v21 = vrot.slane %v650_v11, 1  ;;  %v693_v22 = vrot.slane %v692_v13, 4  ;;  %v564_v31 = vmax.f32 %v563_v56, 0.0 }
  0x9c   :  { %v719_v0 = vsel %vm71_vm0, %v717_v59, %v718_v16  ;;  %v723_v1 = vadd.f32 %v718_v16, %v710_v4  ;;  %v732_v15 = vsel %vm85_vm1, %v730_v17, %v731_v18  ;;  %v609_v23 = vadd.f32 %v608_v40, %v606_v10 }
  0x9d   :  { %v652_v24 = vmax.f32 %v650_v11, %v651_v21  ;;  %v694_v25 = vmax.f32 %v692_v13, %v693_v22  ;;  %v722_v26 = vadd.f32 %v719_v0, %v709_v6  ;;  %v654_v14 = vstv %s1277_s18 }
  0x9e   :  { %v736_v27 = vadd.f32 %v731_v18, %v723_v1  ;;  %v522_v29 = vadd.f32 %v521_v20, %v476_v19  ;;  %v567_v30 = vmul.f32 %v566_v44, %v564_v31  ;;  %v610_v33 = vmax.f32 %v609_v23, 0.0 }
  0x9f   :  { %v695_v12 = vrot.slane %v694_v25, 2  ;;  %v735_v28 = vadd.f32 %v732_v15, %v722_v26  ;;  %v655_v34 = vadd.f32 %v654_v14, %v652_v24  ;;  %v612_v37 = vstv %s1289_s19 }
  0xa0   :  { %v737_v32 = vsel %vm85_vm1, %v736_v27, -inf  ;;  %v568_v42 = vadd.f32 %v567_v30, %v522_v29  ;;  %v700_v43 = vstv %s1293_s20  ;;  %v613_v45 = vmul.f32 %v612_v37, %v610_v33 }
  0xa1   :  { %v696_v35 = vmax.f32 %v694_v25, %v695_v12  ;;  %v738_v36 = vmax.f32 %v735_v28, %v737_v32  ;;  %v656_v62 = vmax.f32 %v655_v34, 0.0  ;;  %v658_v49 = vstv %s821_s21 }
  0xa2   :  { %v614_v51 = vadd.f32 %v613_v45, %v568_v42  ;;  %v704_v55 = vstv %s826_s22  ;;  %v746_v57 = vstv %s830_s23  ;;  %v750_v46 = vstv %s831_s24 }
  0xa3   :  { %v697_v38 = vrot.slane %v696_v35, 1  ;;  %v739_v39 = vrot.slane %v738_v36, 4  ;;  %v659_v52 = vmul.f32 %v658_v49, %v656_v62 }
  0xa5   :  { %v698_v47 = vmax.f32 %v696_v35, %v697_v38  ;;  %v740_v48 = vmax.f32 %v738_v36, %v739_v39  ;;  %v660_v58 = vadd.f32 %v659_v52, %v614_v51 }
  0xa7   :  { %v701_v50 = vadd.f32 %v700_v43, %v698_v47  ;;  %v741_v44 = vrot.slane %v740_v48, 2 }
  0xa9   :  { %v702_v53 = vmax.f32 %v701_v50, 0.0  ;;  %v742_v54 = vmax.f32 %v740_v48, %v741_v44 }
  0xab   :  { %v743_v56 = vrot.slane %v742_v54, 1  ;;  %v705_v60 = vmul.f32 %v704_v55, %v702_v53 }
  0xad   :  { %v744_v63 = vmax.f32 %v742_v54, %v743_v56  ;;  %v706_v2 = vadd.f32 %v705_v60, %v660_v58 }
  0xaf   :  { %v747_v6 = vadd.f32 %v746_v57, %v744_v63 }
  0xb1   :  { %v748_v61 = vmax.f32 %v747_v6, 0.0 }
  0xb3   :  { %v751_v3 = vmul.f32 %v750_v46, %v748_v61 }
  0xb5   :  { %v752_v4 = vadd.f32 %v751_v3, %v706_v2 }
  0xb7   :  { %753 = vst [vmem:[%s1309_s5] sm:$0x1] %v752_v4 }
  0xb8   :  { %758 = vsyncpa [#allocation4], 1 }
  0xb9   :  { %759 = vsyncpa [#allocation6], 1 }

</bundles_post_ra>
